<compile_context>
chip_gen: v7x
topology: tpu7x:2x2x1
jax: 0.10.0
libtpu: 0.0.40
codegen_flags: <defaults>
</compile_context>

<pallas_src>
import jax
import jax.numpy as jnp
from jax.experimental import pallas as pl
from jax.experimental.pallas import tpu as pltpu


# ----------------------------------------------------------------------------
# Tiny stand-in for modulars.GumbelCategorical: just a logits container.
# TODO(synk): Gumbel sampling machinery of GumbelCategorical is not part of the
#             forward hot path; only the logits transform is implemented.
# ----------------------------------------------------------------------------
class GumbelCategorical:
    def __init__(self, logits):
        self.logits = logits


def _round_up(x, m):
    return ((x + m - 1) // m) * m


# ----------------------------------------------------------------------------
# Pallas kernel: one grid step handles TB batch elements.
#   trans_ref : (TB, N, N)  VMEM tile of the relation matrices
#   z_ref     : (TB, N)     VMEM tile of the incoming logits
#   out_ref   : (TB, N)     VMEM tile of the new logits
# ----------------------------------------------------------------------------
def transcell_kernel(trans_ref, z_ref, out_ref):
    t = trans_ref[...].astype(jnp.float32)          # (TB, N, N)
    z = z_ref[...].astype(jnp.float32)              # (TB, N)
    # out[b, i] = sum_j t[b, i, j] * z[b, j]
    # VPU elementwise multiply (sublane-broadcast of z) + XLU lane reduce.
    res = jnp.sum(t * z[:, None, :], axis=-1)       # (TB, N)
    # NOTE: output last dim is N (<128 at small N) -> masked stores, but stores
    # are only ~1/N of total HBM traffic here, so this is negligible.
    out_ref[...] = res.astype(out_ref.dtype)


def transcell_forward(trans_mat, z_logits, *, block_b=None, force_pallas=False,
                      min_pallas_bytes=1 << 20):
    """trans_mat: [B, N, N], z_logits: [B, N] -> new logits [B, N]."""
    B, N, N2 = trans_mat.shape
    assert N == N2 and z_logits.shape == (B, N)

    # Tiny problems: XLA's fused einsum beats any pallas_call launch overhead.
    total_bytes = trans_mat.size * trans_mat.dtype.itemsize
    if not force_pallas and total_bytes < min_pallas_bytes:
        return jnp.einsum("bij,bj->bi", trans_mat, z_logits)

    # --- pick a batch tile size TB ------------------------------------------
    # Padded VMEM bytes of one (N, N) f32 slice: ceil8(N) * ceil128(N) * 4.
    # Target ~2 MiB (padded) per trans_mat buffer; with double buffering plus
    # the z/out tiles this stays well under the 32 MiB VMEM limit on all gens.
    padded_slice_bytes = _round_up(N, 8) * _round_up(N, 128) * 4
    if block_b is None:
        tb = max(8, (2 * 1024 * 1024) // padded_slice_bytes)
    else:
        tb = block_b
    tb = _round_up(min(tb, _round_up(B, 8)), 8)      # multiple of 8, <= padded B

    b_pad = _round_up(B, tb)
    if b_pad != B:
        pad = b_pad - B
        trans_mat_p = jnp.pad(trans_mat, ((0, pad), (0, 0), (0, 0)))
        z_logits_p = jnp.pad(z_logits, ((0, pad), (0, 0)))
    else:
        trans_mat_p = trans_mat
        z_logits_p = z_logits

    grid = (b_pad // tb,)
    out = pl.pallas_call(
        transcell_kernel,
        out_shape=jax.ShapeDtypeStruct((b_pad, N), z_logits.dtype),
        grid=grid,
        in_specs=[
            pl.BlockSpec((tb, N, N), lambda b: (b, 0, 0)),
            pl.BlockSpec((tb, N), lambda b: (b, 0)),
        ],
        out_specs=pl.BlockSpec((tb, N), lambda b: (b, 0)),
        compiler_params=pltpu.CompilerParams(
            dimension_semantics=("parallel",),
            vmem_limit_bytes=32 * 1024 * 1024,
        ),
    )(trans_mat_p, z_logits_p)
    return out[:B]


# ----------------------------------------------------------------------------
# Module wrapper (parameters of the unused FCNets are created for shape parity)
# ----------------------------------------------------------------------------
class TransCell:
    def __init__(self, edge_size, hidden_size, key):
        k1, k2, k3, k4 = jax.random.split(key, 4)
        # FCNet(hidden_size, edge_size): weight-normed Linear + activation
        self.linear_q_w = jax.random.normal(k1, (edge_size, hidden_size), jnp.float32) * 0.02
        self.linear_q_b = jax.random.normal(k2, (edge_size,), jnp.float32) * 0.02
        # FCNet(edge_size, 1, drop=0.1)
        self.linear_out_w = jax.random.normal(k3, (1, edge_size), jnp.float32) * 0.02
        self.linear_out_b = jax.random.normal(k4, (1,), jnp.float32) * 0.02
        # NOTE: these parameters are never touched in forward(), matching PyTorch.

    def __call__(self, trans_mat, z, **kwargs):
        new_logits = transcell_forward(trans_mat, z.logits, **kwargs)
        return GumbelCategorical(new_logits)


if __name__ == "__main__":
    key = jax.random.PRNGKey(0)
    k_mod, k_mat, k_log, k_mat2, k_log2 = jax.random.split(key, 5)

    hidden_size = 32
    edge_size = 8
    cell = TransCell(edge_size, hidden_size, k_mod)

    # --- case 1: module-sized toy input (B=2, N=16), Pallas path forced -----
    B, N = 2, 16
    trans_mat = jax.random.normal(k_mat, (B, N, N), jnp.float32)
    z_logits = jax.random.normal(k_log, (B, N), jnp.float32)
    z = GumbelCategorical(z_logits)

    z_out = cell(trans_mat, z, force_pallas=True)
    out = jax.block_until_ready(z_out.logits)
    ref = jnp.einsum("bij,bj->bi", trans_mat, z_logits)
    assert out.shape == (B, N)
    assert jnp.allclose(out, ref, atol=1e-5, rtol=1e-5), "mismatch vs reference (case 1)"

    # --- case 2: multi-block grid with a batch remainder (tests padding) ----
    B2 = 20
    trans_mat2 = jax.random.normal(k_mat2, (B2, N, N), jnp.float32)
    z_logits2 = jax.random.normal(k_log2, (B2, N), jnp.float32)
    out2 = jax.block_until_ready(
        transcell_forward(trans_mat2, z_logits2, block_b=8, force_pallas=True))
    ref2 = jnp.einsum("bij,bj->bi", trans_mat2, z_logits2)
    assert out2.shape == (B2, N)
    assert jnp.allclose(out2, ref2, atol=1e-5, rtol=1e-5), "mismatch vs reference (case 2)"

    print("KERNEL_OK")
</pallas_src>

<mosaic_0001>
module attributes {stable_mosaic.version = 11 : i64} {
  func.func @transcell_kernel(%arg0: i32, %arg1: memref<8x16x16xf32, #tpu.memory_space<vmem>>, %arg2: memref<8x16xf32, #tpu.memory_space<vmem>>, %arg3: memref<8x16xf32, #tpu.memory_space<vmem>>) attributes {dimension_semantics = [#tpu.dimension_semantics<parallel>], iteration_bounds = array<i64: 1>, scalar_prefetch = 0 : i64, scratch_operands = 0 : i64, tpu.core_type = #tpu.core_type<tc>, window_params = [{transform_indices = @transform_0, window_bounds = array<i64: 8, 16, 16>}, {transform_indices = @transform_1, window_bounds = array<i64: 8, 16>}, {transform_indices = @transform_2, window_bounds = array<i64: 8, 16>}]} {
    %c0 = arith.constant 0 : index
    %c0_0 = arith.constant 0 : index
    %c0_1 = arith.constant 0 : index
    %0 = vector.load %arg1[%c0, %c0_0, %c0_1] : memref<8x16x16xf32, #tpu.memory_space<vmem>>, vector<8x16x16xf32>
    %c0_2 = arith.constant 0 : index
    %c0_3 = arith.constant 0 : index
    %1 = vector.load %arg2[%c0_2, %c0_3] : memref<8x16xf32, #tpu.memory_space<vmem>>, vector<8x16xf32>
    %2 = vector.shape_cast %1 : vector<8x16xf32> to vector<8x1x16xf32>
    %3 = vector.broadcast %2 : vector<8x1x16xf32> to vector<8x16x16xf32>
    %4 = arith.mulf %0, %3 : vector<8x16x16xf32>
    %cst = arith.constant dense<0.000000e+00> : vector<8x16xf32>
    %5 = vector.multi_reduction <add>, %4, %cst [2] : vector<8x16x16xf32> to vector<8x16xf32>
    %c0_4 = arith.constant 0 : index
    %c0_5 = arith.constant 0 : index
    %6 = vector.load %arg3[%c0_4, %c0_5] : memref<8x16xf32, #tpu.memory_space<vmem>>, vector<8x16xf32>
    tpu.vector_store %arg3[%c0_4, %c0_5], %5 {strides = array<i32>} : memref<8x16xf32, #tpu.memory_space<vmem>>, vector<8x16xf32>,
    return
  }
  func.func @transform_0(%arg0: i32) -> (i32, i32, i32) {
    %c0_i32 = arith.constant 0 : i32
    %c0_i32_0 = arith.constant 0 : i32
    %c0_i32_1 = arith.constant 0 : i32
    return %arg0, %c0_i32, %c0_i32_0 : i32, i32, i32
  }
  func.func @transform_1(%arg0: i32) -> (i32, i32) {
    %c0_i32 = arith.constant 0 : i32
    %c0_i32_0 = arith.constant 0 : i32
    return %arg0, %c0_i32 : i32, i32
  }
  func.func @transform_2(%arg0: i32) -> (i32, i32) {
    %c0_i32 = arith.constant 0 : i32
    %c0_i32_0 = arith.constant 0 : i32
    return %arg0, %c0_i32 : i32, i32
  }
}

</mosaic_0001>

<bundles_post_ra>
// kernel: tpu_custom_call.1
= control target key start
LH: loop header
LB: loop body
LE: loop exit
PB: predicated region body
PF: predicated region fallthrough
CT: control target
= control target key end

     0   :  { %7 = vsyncpa [#allocation3], 0  ;;  %s535_s0 = inlined_call_operand.hbm [shape: f32[8,16,16], index: 0, kind: input, shape index: {}]   ;;  %s536_s1 = inlined_call_operand.hbm [shape: f32[8,16], index: 1, kind: input, shape index: {}]   ;;  %s537_s2 = inlined_call_operand.hbm [shape: f32[8,16], index: 2, kind: output, shape index: {}]  }
   0x1   :  { %8 = vsyncpa [#allocation6], 0 }
   0x2   :  { %9 = vsyncpa [#allocation4], 0  ;;  %s413_s9 = smov [#allocation2]   ;;  %s341_s13 = scalar_lea.hbm %s535_s0, 2048 }
   0x3   :  { %s15_s10 = sshll.u32 %s413_s9, 4  ;;  %p342_p0 = scmp.ne.s32.totalorder %s535_s0, %s341_s13  ;;  %s16_s10 = int_to_ptr.vmem [resolvable:$true] %s15_s10 }
   0x4   :  { %p345_p1 = scmp.lt.u32.totalorder %s341_s13, %s535_s0 }
   0x6   :  { %p347_p2 = pnand %p345_p1, %p342_p0 }
   0x8   :  { %350 = shalt.err (!%p347_p2)
}
   0x9   :  { %s351_s18 = scalar_lea.vmem %s16_s10, 2048  ;;  %p356_p4 = scmp.lt.s32.totalorder %s16_s10, %s16_s10 }
   0xa   :  { %p352_p3 = scmp.ne.s32.totalorder %s16_s10, %s351_s18  ;;  %p357_p5 = scmp.lt.s32.totalorder %s351_s18, %s351_s18 }
   0xc   :  { %p358_p6 = por %p357_p5, %p356_p4 }
   0xe   :  { %p359_p7 = pnand %p358_p6, %p352_p3 }
  0x10   :  { %362 = shalt.err (!%p359_p7)
}
  0x11   :  { %s414_s19 = smov 128   ;;  %s415_s20 = smov 8  }
  0x12   :  { %21 = dma.hbm_to_vmem [thread:$0]  %s535_s0, 2048, %s16_s10, [#allocation3], %s414_s19, %s414_s19, %s415_s20  }
  0x13   :  { %s416_s23 = smov [#allocation5]   ;;  %s363_s27 = scalar_lea.hbm %s536_s1, 128 }
  0x14   :  { %s28_s24 = sshll.u32 %s416_s23, 4  ;;  %p364_p8 = scmp.ne.s32.totalorder %s536_s1, %s363_s27  ;;  %s29_s24 = int_to_ptr.vmem [resolvable:$true] %s28_s24 }
  0x15   :  { %p367_p9 = scmp.lt.u32.totalorder %s363_s27, %s536_s1 }
  0x17   :  { %p369_p10 = pnand %p367_p9, %p364_p8 }
  0x19   :  { %372 = shalt.err (!%p369_p10)
}
  0x1a   :  { %s373_s4 = scalar_lea.vmem %s29_s24, 128  ;;  %p378_p12 = scmp.lt.s32.totalorder %s29_s24, %s29_s24 }
  0x1b   :  { %p374_p11 = scmp.ne.s32.totalorder %s29_s24, %s373_s4  ;;  %p379_p13 = scmp.lt.s32.totalorder %s373_s4, %s373_s4 }
  0x1d   :  { %p380_p0 = por %p379_p13, %p378_p12 }
  0x1f   :  { %p381_p1 = pnand %p380_p0, %p374_p11 }
  0x21   :  { %384 = shalt.err (!%p381_p1)
}
  0x22   :  { %31 = dma.hbm_to_vmem [thread:$0]  %s536_s1, 128, %s29_s24, [#allocation6]  }
  0x23   :  { %407 = dma.done.wait [#allocation3], 2048  }
  0x24   :  { %408 = vsyncadd [#allocation3], 4294965248 }
  0x25   :  { %409 = dma.done.wait [#allocation6], 128  }
  0x26   :  { %410 = vsyncadd [#allocation6], 4294967168  ;;  %v60_v0 = vlaneseq  ;;  %v417_v1 = vmov 1966171168   ;;  %v54_v8 = vld [vmem:[#allocation5] sm:$0xff]  ;;  %v39_v16 = vld [vmem:[#allocation2 + $0x8] sm:$0xff] }
  0x27   :  { %v58_v2 = vunpack.c.l.s4 %v417_v1  ;;  %v56_v9 = vcombine.high %v54_v8, %v54_v8  ;;  %v38_v15 = vld [vmem:[#allocation2] sm:$0xff]  ;;  %vm161_vm0 = vcmask 130048   ;;  %v40_v20 = vld [vmem:[#allocation2 + $0x10] sm:$0xff]  ;;  %v41_v21 = vld [vmem:[#allocation2 + $0x18] sm:$0xff]  ;;  %vm237_vm1 = vcmask 130112   ;;  %s418_s1 = smov [#allocation7]  }
  0x28   :  { %v458_v3 = vshrl.u32 %v60_v0, 7  ;;  %v460_v4 = vand.u32 127, %v60_v0  ;;  %v42_v27 = vld [vmem:[#allocation2 + $0x20] sm:$0xff]  ;;  %v43_v31 = vld [vmem:[#allocation2 + $0x28] sm:$0xff]  ;;  %v44_v46 = vld [vmem:[#allocation2 + $0x30] sm:$0xff]  ;;  %vm302_vm2 = vcmask 1041409  }
  0x29   :  { %v59_v5 = vunpack.c.0.s8 %v58_v2  ;;  %v46_v38 = vld [vmem:[#allocation2 + $0x40] sm:$0xff]  ;;  %v47_v41 = vld [vmem:[#allocation2 + $0x48] sm:$0xff]  ;;  %v45_v49 = vld [vmem:[#allocation2 + $0x38] sm:$0xff]  ;;  %vm304_vm3 = vcmask 1042434   ;;  %vm306_vm4 = vcmask 1043459   ;;  %vm308_vm5 = vcmask 1044484  }
  0x2a   :  { %v464_v6 = vsub.s32 %v460_v4, %v458_v3  ;;  %v468_v11 = vsub.s32 0, %v458_v3  ;;  %v48_v54 = vld [vmem:[#allocation2 + $0x50] sm:$0xff]  ;;  %v49_v57 = vld [vmem:[#allocation2 + $0x58] sm:$0xff]  ;;  %v50_v62 = vld [vmem:[#allocation2 + $0x60] sm:$0xff]  ;;  %v232_v63 = vadd.s32 4294967288, %v460_v4  ;;  %vm310_vm6 = vcmask 1045509  }
  0x2b   :  { %v62_v7 = vsub.s32 %v59_v5, %v458_v3  ;;  %v51_v2 = vld [vmem:[#allocation2 + $0x68] sm:$0xff]  ;;  %v53_v4 = vld [vmem:[#allocation2 + $0x78] sm:$0xff]  ;;  %vm312_vm7 = vcmask 1046534   ;;  %s324_s6 = sshll.u32 %s418_s1, 4  ;;  %vm314_vm8 = vcmask 1047559   ;;  %s325_s6 = int_to_ptr.vmem [resolvable:$true] %s324_s6 }
  0x2c   :  { %v489_v5 = vsub.s32 %v232_v63, %v458_v3  ;;  %s385_s7 = scalar_lea.vmem %s325_s6, 128  ;;  %p390_p3 = scmp.lt.s32.totalorder %s325_s6, %s325_s6 }
  0x2d   :  { %v63_v10 = vrot.slane %v54_v8, %v62_v7  ;;  %v70_v14 = vrot.slane %v56_v9, %v62_v7  ;;  %p386_p2 = scmp.ne.s32.totalorder %s325_s6, %s385_s7  ;;  %p391_p4 = scmp.lt.s32.totalorder %s385_s7, %s385_s7 }
  0x2f   :  { %v79_v12 = vrot.slane %v63_v10, %v62_v7  ;;  %v71_v13 = vcombine.high %v63_v10, %v63_v10  ;;  %v86_v22 = vrot.slane %v70_v14, %v62_v7  ;;  %v72_v33 = vcombine.high %v70_v14, %v70_v14  ;;  %v52_v10 = vld [vmem:[#allocation2 + $0x70] sm:$0xff]  ;;  %p392_p5 = por %p391_p4, %p390_p3 }
  0x31   :  { %v108_v17 = vrot.slane %v79_v12, %v468_v11  ;;  %v93_v18 = vrot.slane %v71_v13, %v62_v7  ;;  %v101_v19 = vcombine.high %v79_v12, %v79_v12  ;;  %v124_v32 = vrot.slane %v86_v22, %v468_v11  ;;  %p393_p6 = pnand %p392_p5, %p386_p2 }
  0x32   :  { %v100_v45 = vrot.slane %v72_v33, %v62_v7  ;;  %v102_v53 = vcombine.high %v86_v22, %v86_v22 }
  0x33   :  { %v145_v23 = vmul.f32 %v108_v17, %v38_v15  ;;  %v112_v24 = vrot.slane %v93_v18, %v468_v11  ;;  %v146_v25 = vmul.f32 %v108_v17, %v39_v16  ;;  %v116_v26 = vrot.slane %v101_v19, %v468_v11 }
  0x34   :  { %v103_v37 = vcombine.high %v93_v18, %v93_v18  ;;  %v153_v43 = vmul.f32 %v124_v32, %v46_v38  ;;  %v154_v48 = vmul.f32 %v124_v32, %v47_v41  ;;  %v128_v52 = vrot.slane %v100_v45, %v468_v11 }
  0x35   :  { %v162_v28 = vsel %vm161_vm0, %v145_v23, 0.0  ;;  %v147_v29 = vmul.f32 %v112_v24, %v40_v20  ;;  %v148_v30 = vmul.f32 %v112_v24, %v41_v21  ;;  %v165_v35 = vsel %vm161_vm0, %v146_v25, 0.0 }
  0x36   :  { %163 = vadd.xlane.f32.xlu0 %v162_v28  ;;  %v149_v36 = vmul.f32 %v116_v26, %v42_v27  ;;  %v150_v40 = vmul.f32 %v116_v26, %v43_v31  ;;  %v120_v44 = vrot.slane %v103_v37, %v468_v11  ;;  %v186_v50 = vsel %vm161_vm0, %v153_v43, 0.0 }
  0x37   :  { %v168_v34 = vsel %vm161_vm0, %v147_v29, 0.0  ;;  %v171_v39 = vsel %vm161_vm0, %v148_v30, 0.0  ;;  %v189_v55 = vsel %vm161_vm0, %v154_v48, 0.0  ;;  %v155_v59 = vmul.f32 %v128_v52, %v48_v54 }
  0x38   :  { %169 = vadd.xlane.f32.xlu1 %v168_v34  ;;  %v174_v42 = vsel %vm161_vm0, %v149_v36, 0.0  ;;  %v177_v47 = vsel %vm161_vm0, %v150_v40, 0.0  ;;  %v151_v51 = vmul.f32 %v120_v44, %v44_v46  ;;  %v152_v56 = vmul.f32 %v120_v44, %v45_v49 }
  0x39   :  { %v132_v60 = vrot.slane %v102_v53, %v468_v11  ;;  %v104_v61 = vcombine.high %v100_v45, %v100_v45  ;;  %v156_v1 = vmul.f32 %v128_v52, %v49_v57  ;;  %v192_v7 = vsel %vm161_vm0, %v155_v59, 0.0 }
  0x3a   :  { %166 = vadd.xlane.f32.xlu0 %v165_v35  ;;  %v180_v58 = vsel %vm161_vm0, %v151_v51, 0.0  ;;  %v183_v0 = vsel %vm161_vm0, %v152_v56, 0.0 }
  0x3b   :  { %v157_v8 = vmul.f32 %v132_v60, %v50_v62  ;;  %v136_v9 = vrot.slane %v104_v61, %v468_v11  ;;  %v195_v12 = vsel %vm161_vm0, %v156_v1, 0.0  ;;  %v158_v13 = vmul.f32 %v132_v60, %v51_v2 }
  0x3c   :  { %172 = vadd.xlane.f32.xlu1 %v171_v39 }
  0x3d   :  { %v198_v14 = vsel %vm161_vm0, %v157_v8, 0.0  ;;  %v159_v15 = vmul.f32 %v136_v9, %v52_v10  ;;  %v201_v16 = vsel %vm161_vm0, %v158_v13, 0.0  ;;  %v160_v3 = vmul.f32 %v136_v9, %v53_v4 }
  0x3e   :  { %175 = vadd.xlane.f32.xlu0 %v174_v42 }
  0x3f   :  { %v204_v17 = vsel %vm161_vm0, %v159_v15, 0.0  ;;  %v207_v11 = vsel %vm161_vm0, %v160_v3, 0.0 }
  0x40   :  { %178 = vadd.xlane.f32.xlu1 %v177_v47 }
  0x42   :  { %187 = vadd.xlane.f32.xlu0 %v186_v50 }
  0x44   :  { %190 = vadd.xlane.f32.xlu1 %v189_v55 }
  0x46   :  { %181 = vadd.xlane.f32.xlu0 %v180_v58 }
  0x48   :  { %184 = vadd.xlane.f32.xlu1 %v183_v0 }
  0x4a   :  { %193 = vadd.xlane.f32.xlu0 %v192_v7 }
  0x4c   :  { %196 = vadd.xlane.f32.xlu1 %v195_v12 }
  0x4e   :  { %199 = vadd.xlane.f32.xlu0 %v198_v14 }
  0x50   :  { %202 = vadd.xlane.f32.xlu1 %v201_v16 }
  0x52   :  { %205 = vadd.xlane.f32.xlu0 %v204_v17 }
  0x54   :  { %208 = vadd.xlane.f32.xlu1 %v207_v11 }
  0xc3   :  { %v164_v18 = vpop.xlane.xlu0 %163 }
  0xc4   :  { %v231_v21 = vrot.slane %v164_v18, %v464_v6 }
  0xc5   :  { %v170_v19 = vpop.xlane.xlu1 %169 }
  0xc6   :  { %v242_v24 = vrot.slane %v170_v19, %v464_v6 }
  0xc7   :  { %v167_v20 = vpop.xlane.xlu0 %166 }
  0xc8   :  { %v236_v22 = vrot.slane %v167_v20, %v489_v5 }
  0xc9   :  { %v173_v23 = vpop.xlane.xlu1 %172 }
  0xca   :  { %v238_v25 = vsel %vm237_vm1, %v236_v22, %v231_v21  ;;  %v246_v26 = vrot.slane %v173_v23, %v489_v5 }
  0xcb   :  { %v176_v27 = vpop.xlane.xlu0 %175 }
  0xcc   :  { %v247_v28 = vsel %vm237_vm1, %v246_v26, %v242_v24  ;;  %v251_v29 = vrot.slane %v176_v27, %v464_v6 }
  0xcd   :  { %v303_v30 = vsel %vm302_vm2, %v247_v28, %v238_v25  ;;  %v179_v31 = vpop.xlane.xlu1 %178 }
  0xce   :  { %v255_v32 = vrot.slane %v179_v31, %v489_v5 }
  0xcf   :  { %v188_v33 = vpop.xlane.xlu0 %187 }
  0xd0   :  { %v256_v34 = vsel %vm237_vm1, %v255_v32, %v251_v29  ;;  %v269_v35 = vrot.slane %v188_v33, %v464_v6 }
  0xd1   :  { %v305_v36 = vsel %vm304_vm3, %v256_v34, %v303_v30  ;;  %v191_v37 = vpop.xlane.xlu1 %190 }
  0xd2   :  { %v273_v38 = vrot.slane %v191_v37, %v489_v5 }
  0xd3   :  { %v182_v39 = vpop.xlane.xlu0 %181 }
  0xd4   :  { %v274_v40 = vsel %vm237_vm1, %v273_v38, %v269_v35  ;;  %v260_v41 = vrot.slane %v182_v39, %v464_v6 }
  0xd5   :  { %v185_v42 = vpop.xlane.xlu1 %184 }
  0xd6   :  { %v264_v43 = vrot.slane %v185_v42, %v489_v5 }
  0xd7   :  { %v194_v44 = vpop.xlane.xlu0 %193 }
  0xd8   :  { %v265_v45 = vsel %vm237_vm1, %v264_v43, %v260_v41  ;;  %v278_v46 = vrot.slane %v194_v44, %v464_v6 }
  0xd9   :  { %v307_v47 = vsel %vm306_vm4, %v265_v45, %v305_v36  ;;  %v197_v48 = vpop.xlane.xlu1 %196 }
  0xda   :  { %v282_v49 = vrot.slane %v197_v48, %v489_v5  ;;  %v309_v50 = vsel %vm308_vm5, %v274_v40, %v307_v47 }
  0xdb   :  { %v200_v51 = vpop.xlane.xlu0 %199 }
  0xdc   :  { %v283_v52 = vsel %vm237_vm1, %v282_v49, %v278_v46  ;;  %v287_v53 = vrot.slane %v200_v51, %v464_v6 }
  0xdd   :  { %v311_v54 = vsel %vm310_vm6, %v283_v52, %v309_v50  ;;  %v203_v55 = vpop.xlane.xlu1 %202 }
  0xde   :  { %v291_v56 = vrot.slane %v203_v55, %v489_v5 }
  0xdf   :  { %v206_v57 = vpop.xlane.xlu0 %205 }
  0xe0   :  { %v292_v58 = vsel %vm237_vm1, %v291_v56, %v287_v53  ;;  %v296_v59 = vrot.slane %v206_v57, %v464_v6 }
  0xe1   :  { %v209_v60 = vpop.xlane.xlu1 %208  ;;  %v313_v61 = vsel %vm312_vm7, %v292_v58, %v311_v54 }
  0xe2   :  { %v300_v62 = vrot.slane %v209_v60, %v489_v5 }
  0xe4   :  { %v301_v63 = vsel %vm237_vm1, %v300_v62, %v296_v59 }
  0xe5   :  { %v315_v0 = vsel %vm314_vm8, %v301_v63, %v313_v61 }
  0xe6   :  { %317 = vst.msk [vmem:[#allocation7] sm:$0xff] %vm161_vm0, %v315_v0 }
  0xe7   :  { %396 = shalt.err (!%p393_p6)
}
  0xe8   :  { %s397_s10 = scalar_lea.hbm %s537_s2, 128 }
  0xe9   :  { %p398_p7 = scmp.ne.s32.totalorder %s537_s2, %s397_s10  ;;  %p401_p8 = scmp.lt.u32.totalorder %s397_s10, %s537_s2 }
  0xeb   :  { %p403_p9 = pnand %p401_p8, %p398_p7 }
  0xed   :  { %406 = shalt.err (!%p403_p9)
}
  0xee   :  { %327 = dma.vmem_to_hbm [thread:$0]  %s325_s6, 128, %s537_s2, [#allocation4]  }
  0xef   :  { %411 = dma.done.wait [#allocation4], 128  }
  0xf0   :  { %412 = vsyncadd [#allocation4], 4294967168 }
  0xf1   :  { %331 = vsyncpa [#allocation3], 1 }
  0xf2   :  { %332 = vsyncpa [#allocation6], 1 }
  0xf3   :  { %333 = vsyncpa [#allocation4], 1 }

</bundles_post_ra>
